<compile_context>
chip_gen: v7x
topology: tpu7x:2x2x1
jax: 0.10.0
libtpu: 0.0.40
codegen_flags: <defaults>
</compile_context>

<pallas_src>
import functools

import jax
import jax.numpy as jnp
from jax.experimental import pallas as pl
from jax.experimental.pallas import tpu as pltpu

_HIGHEST = jax.lax.Precision.HIGHEST


def _round_up(x, m):
    return (x + m - 1) // m * m


def _mlp_kernel(x_ref, *refs, n_hidden_linears):
    """Whole-MLP forward for one batch tile.

    x_ref:   [tile_b, n_input]   (batch-major block, straight from HBM)
    out_ref: [1, tile_b]         (lane-dense output row)
    refs (all VMEM-resident, before out_ref):
      layer 0:                W0 [n_input, hidden], b0 [1, hidden]
      hidden linears 1..L-1:  W^T [hidden, hidden], b  [hidden, 1]
      final linear (L >= 2):  w   [hidden, 1],      b  [1, 1]
      final linear (L == 1):  w^T [1, hidden],      b  [1, 1]
    """
    out_ref = refs[-1]
    p = refs[:-1]

    x = x_ref[...].astype(jnp.float32)                       # [tile_b, n_input]

    # Layer 0: batch-major, standard MXU matmul (K = n_input is tiny).
    a = jnp.dot(x, p[0][...], preferred_element_type=jnp.float32,
                precision=_HIGHEST) + p[1][...]              # [tile_b, hidden]
    a = jnp.maximum(a, 0.0)

    if n_hidden_linears >= 2:
        # Layer 1: transition to feature-major via A @ B^T (contract both operands on
        # their last dim), putting the batch on the 128-wide lane axis without any
        # explicit transpose op.
        h = jax.lax.dot_general(
            p[2][...], a, (((1,), (1,)), ((), ())),
            preferred_element_type=jnp.float32, precision=_HIGHEST)   # [hidden, tile_b]
        h = jnp.maximum(h + p[3][...], 0.0)

        # Remaining hidden layers: feature-major standard matmuls (W^T @ h).
        for li in range(2, n_hidden_linears):
            wt = p[2 * li][...]                               # [hidden, hidden]
            bc = p[2 * li + 1][...]                           # [hidden, 1]
            h = jnp.dot(wt, h, preferred_element_type=jnp.float32,
                        precision=_HIGHEST) + bc
            h = jnp.maximum(h, 0.0)

        # Final Linear(hidden -> 1): VPU multiply + sublane (XLU) reduce -> [1, tile_b].
        w_last = p[-2][...]                                   # [hidden, 1]
        b_last = p[-1][...]                                   # [1, 1]
        y = jnp.sum(h * w_last, axis=0, keepdims=True) + b_last
    else:
        # Single hidden linear: the final Linear itself does the feature-major transition.
        y = jax.lax.dot_general(
            p[-2][...], a, (((1,), (1,)), ((), ())),
            preferred_element_type=jnp.float32, precision=_HIGHEST) + p[-1][...]

    out_ref[...] = y.astype(out_ref.dtype)                    # [1, tile_b], lane-dense


def value_model_forward(x, params, *, tile_b=8192, vmem_budget_bytes=10 * 1024 * 1024):
    """x: [B, n_input] f32 (batch-major, exactly what the PyTorch module takes).

    params: list of (W, b) per nn.Linear with W: [in, out], b: [1, out].
    """
    B, n_input = x.shape
    n_linear = len(params)
    n_hidden_linears = n_linear - 1
    hidden = params[0][0].shape[1]
    assert params[-1][0].shape[1] == 1, "final layer must map to a single output"

    # ---- batch-tile selection (lane axis) --------------------------------------------
    # Generous per-batch-column VMEM bound (f32): double-buffered input block + a few live
    # [hidden, tile] activations + output.  Clamp the tile against it so the kernel fits
    # comfortably on every chip (v7x has only 64 MiB physical VMEM / 32 MiB scoped default).
    bytes_per_col = 4 * (2 * n_input + 6 * max(hidden, 8) + 4)
    vmem_cap = max(128, (vmem_budget_bytes // bytes_per_col) // 128 * 128)
    tile_cap = max(128, min(_round_up(tile_b, 128), vmem_cap))

    num_tiles = max(1, -(-B // tile_cap))
    if B > 128:
        num_tiles = max(num_tiles, 2)       # let the batch axis span both v7x TensorCores
    tile = _round_up(-(-B // num_tiles), 128)   # >=128 lanes: full vregs, unmasked stores
    padded_B = _round_up(B, tile)
    num_tiles = padded_B // tile

    x_in = x if padded_B == B else jnp.pad(x, ((0, padded_B - B), (0, 0)))

    # ---- flatten params into the layouts the kernel expects ---------------------------
    flat_params = []
    for li, (w, b) in enumerate(params):
        if li == 0:
            flat_params += [w, b.reshape(1, -1)]             # [n_input, hidden], [1, hidden]
        elif li < n_hidden_linears:
            flat_params += [w.T, b.reshape(-1, 1)]           # [hidden, hidden],  [hidden, 1]
        elif n_hidden_linears >= 2:
            flat_params += [w, b.reshape(1, 1)]              # [hidden, 1],       [1, 1]
        else:
            flat_params += [w.T, b.reshape(1, 1)]            # [1, hidden],       [1, 1]
    # NOTE: packing these tiny arrays into one resident slab would shave a few DMA
    # descriptors off kernel entry; skipped here as a minor win vs. added complexity.

    vmem_resident = pl.BlockSpec(memory_space=pltpu.MemorySpace.VMEM)  # tiny, not pipelined
    in_specs = [pl.BlockSpec((tile, n_input), lambda i: (i, 0))]
    in_specs += [vmem_resident] * len(flat_params)

    kernel = functools.partial(_mlp_kernel, n_hidden_linears=n_hidden_linears)

    out_row = pl.pallas_call(
        kernel,
        out_shape=jax.ShapeDtypeStruct((1, padded_B), x.dtype),
        grid_spec=pltpu.PrefetchScalarGridSpec(
            num_scalar_prefetch=0,
            grid=(num_tiles,),
            in_specs=in_specs,
            out_specs=pl.BlockSpec((1, tile), lambda i: (0, i)),
        ),
        compiler_params=pltpu.CompilerParams(
            # "parallel" lets the runtime shard batch tiles across v7x's 2 TensorCores;
            # switch to pltpu.CORE_PARALLEL if profiling shows a single TC busy.
            dimension_semantics=("parallel",),
            vmem_limit_bytes=32 * 1024 * 1024,   # safe on v5e/v6e/v7x; usage is ~3-5 MiB
        ),
    )(x_in, *flat_params)

    # [1, padded_B] -> [B, 1]: drop batch padding; the reshape is memory-order preserving.
    return out_row[0, :B].reshape(B, 1)


def init_params(key, n_input, hidden_units, hidden_layers):
    """Deterministic param init matching the PyTorch module's layer shapes."""
    dims = [n_input] + [hidden_units] * hidden_layers + [1]
    params = []
    for i in range(len(dims) - 1):
        key, kw, kb = jax.random.split(key, 3)
        bound = 1.0 / jnp.sqrt(dims[i])
        w = jax.random.uniform(kw, (dims[i], dims[i + 1]), jnp.float32, -bound, bound)
        b = jax.random.uniform(kb, (1, dims[i + 1]), jnp.float32, -bound, bound)
        params.append((w, b))
    return params


def reference_forward(x, params):
    h = x
    for li, (w, b) in enumerate(params):
        h = jnp.dot(h, w, precision=_HIGHEST) + b
        if li < len(params) - 1:
            h = jnp.maximum(h, 0.0)
    return h


if __name__ == "__main__":
    n_input, hidden_units, hidden_layers = 4, 32, 3

    key = jax.random.PRNGKey(0)
    key, kx = jax.random.split(key)
    params = init_params(key, n_input, hidden_units, hidden_layers)

    # Small batch: single 128-lane tile (batch padded 16 -> 128), grid=(1,).
    x_small = jax.random.normal(kx, (16, n_input), dtype=jnp.float32)
    out_small = jax.block_until_ready(value_model_forward(x_small, params))
    assert out_small.shape == (16, 1)
    assert jnp.allclose(out_small, reference_forward(x_small, params), atol=1e-5, rtol=1e-5)

    # Ragged batch: exercises zero-padding + the >=2-tile (dual-TensorCore) path.
    x_mid = jax.random.normal(jax.random.PRNGKey(1), (300, n_input), dtype=jnp.float32)
    out_mid = jax.block_until_ready(value_model_forward(x_mid, params))
    assert out_mid.shape == (300, 1)
    assert jnp.allclose(out_mid, reference_forward(x_mid, params), atol=1e-5, rtol=1e-5)

    # Larger batch: exercises the big-tile multi-tile path.
    x_big = jax.random.normal(jax.random.PRNGKey(2), (4096, n_input), dtype=jnp.float32)
    out_big = jax.block_until_ready(value_model_forward(x_big, params, tile_b=2048))
    assert out_big.shape == (4096, 1)
    assert jnp.allclose(out_big, reference_forward(x_big, params), atol=1e-5, rtol=1e-5)

    print("KERNEL_OK")
</pallas_src>

<mosaic_0001>
module attributes {stable_mosaic.version = 11 : i64} {
  func.func @_mlp_kernel(%arg0: i32, %arg1: memref<128x4xf32, #tpu.memory_space<vmem>>, %arg2: memref<4x32xf32, #tpu.memory_space<vmem>>, %arg3: memref<1x32xf32, #tpu.memory_space<vmem>>, %arg4: memref<32x32xf32, #tpu.memory_space<vmem>>, %arg5: memref<32x1xf32, #tpu.memory_space<vmem>>, %arg6: memref<32x32xf32, #tpu.memory_space<vmem>>, %arg7: memref<32x1xf32, #tpu.memory_space<vmem>>, %arg8: memref<32x1xf32, #tpu.memory_space<vmem>>, %arg9: memref<1x1xf32, #tpu.memory_space<vmem>>, %arg10: memref<1x128xf32, #tpu.memory_space<vmem>>) attributes {dimension_semantics = [#tpu.dimension_semantics<parallel>], iteration_bounds = array<i64: 1>, scalar_prefetch = 0 : i64, scratch_operands = 0 : i64, tpu.core_type = #tpu.core_type<tc>, window_params = [{transform_indices = @transform_0, window_bounds = array<i64: 128, 4>}, {pipeline_mode = #tpu.pipeline_mode<synchronous>, transform_indices = @transform_1, window_bounds = array<i64: 4, 32>}, {pipeline_mode = #tpu.pipeline_mode<synchronous>, transform_indices = @transform_2, window_bounds = array<i64: 1, 32>}, {pipeline_mode = #tpu.pipeline_mode<synchronous>, transform_indices = @transform_3, window_bounds = array<i64: 32, 32>}, {pipeline_mode = #tpu.pipeline_mode<synchronous>, transform_indices = @transform_4, window_bounds = array<i64: 32, 1>}, {pipeline_mode = #tpu.pipeline_mode<synchronous>, transform_indices = @transform_5, window_bounds = array<i64: 32, 32>}, {pipeline_mode = #tpu.pipeline_mode<synchronous>, transform_indices = @transform_6, window_bounds = array<i64: 32, 1>}, {pipeline_mode = #tpu.pipeline_mode<synchronous>, transform_indices = @transform_7, window_bounds = array<i64: 32, 1>}, {pipeline_mode = #tpu.pipeline_mode<synchronous>, transform_indices = @transform_8, window_bounds = array<i64: 1, 1>}, {transform_indices = @transform_9, window_bounds = array<i64: 1, 128>}]} {
    %c0 = arith.constant 0 : index
    %c0_0 = arith.constant 0 : index
    %0 = vector.load %arg1[%c0, %c0_0] : memref<128x4xf32, #tpu.memory_space<vmem>>, vector<128x4xf32>
    %c0_1 = arith.constant 0 : index
    %c0_2 = arith.constant 0 : index
    %1 = vector.load %arg2[%c0_1, %c0_2] : memref<4x32xf32, #tpu.memory_space<vmem>>, vector<4x32xf32>
    %cst = arith.constant dense<0.000000e+00> : vector<128x32xf32>
    %2 = tpu.matmul %0, %1, %cst {dimension_numbers = #tpu.dot_dimension_numbers<[1], [0], [0], [1], [0, 0, 1, 1], [], []>, precision = #tpu.contract_precision<fp32>} : vector<128x4xf32>, vector<4x32xf32>, vector<128x32xf32> -> vector<128x32xf32>
    %c0_3 = arith.constant 0 : index
    %c0_4 = arith.constant 0 : index
    %3 = vector.load %arg3[%c0_3, %c0_4] : memref<1x32xf32, #tpu.memory_space<vmem>>, vector<1x32xf32>
    %4 = vector.broadcast %3 : vector<1x32xf32> to vector<128x32xf32>
    %5 = arith.addf %2, %4 : vector<128x32xf32>
    %cst_5 = arith.constant 0.000000e+00 : f32
    %6 = vector.broadcast %cst_5 : f32 to vector<128x32xf32>
    %7 = arith.maximumf %5, %6 : vector<128x32xf32>
    %c0_6 = arith.constant 0 : index
    %c0_7 = arith.constant 0 : index
    %8 = vector.load %arg4[%c0_6, %c0_7] : memref<32x32xf32, #tpu.memory_space<vmem>>, vector<32x32xf32>
    %cst_8 = arith.constant dense<0.000000e+00> : vector<32x128xf32>
    %9 = tpu.matmul %8, %7, %cst_8 {dimension_numbers = #tpu.dot_dimension_numbers<[1], [1], [0], [0], [0, 0, 1, 0], [], []>, precision = #tpu.contract_precision<fp32>} : vector<32x32xf32>, vector<128x32xf32>, vector<32x128xf32> -> vector<32x128xf32>
    %c0_9 = arith.constant 0 : index
    %c0_10 = arith.constant 0 : index
    %10 = vector.load %arg5[%c0_9, %c0_10] : memref<32x1xf32, #tpu.memory_space<vmem>>, vector<32x1xf32>
    %11 = vector.broadcast %10 : vector<32x1xf32> to vector<32x128xf32>
    %12 = arith.addf %9, %11 : vector<32x128xf32>
    %cst_11 = arith.constant 0.000000e+00 : f32
    %13 = vector.broadcast %cst_11 : f32 to vector<32x128xf32>
    %14 = arith.maximumf %12, %13 : vector<32x128xf32>
    %c0_12 = arith.constant 0 : index
    %c0_13 = arith.constant 0 : index
    %15 = vector.load %arg6[%c0_12, %c0_13] : memref<32x32xf32, #tpu.memory_space<vmem>>, vector<32x32xf32>
    %c0_14 = arith.constant 0 : index
    %c0_15 = arith.constant 0 : index
    %16 = vector.load %arg7[%c0_14, %c0_15] : memref<32x1xf32, #tpu.memory_space<vmem>>, vector<32x1xf32>
    %cst_16 = arith.constant dense<0.000000e+00> : vector<32x128xf32>
    %17 = tpu.matmul %15, %14, %cst_16 {dimension_numbers = #tpu.dot_dimension_numbers<[1], [0], [0], [1], [0, 0, 1, 1], [], []>, precision = #tpu.contract_precision<fp32>} : vector<32x32xf32>, vector<32x128xf32>, vector<32x128xf32> -> vector<32x128xf32>
    %18 = vector.broadcast %16 : vector<32x1xf32> to vector<32x128xf32>
    %19 = arith.addf %17, %18 : vector<32x128xf32>
    %cst_17 = arith.constant 0.000000e+00 : f32
    %20 = vector.broadcast %cst_17 : f32 to vector<32x128xf32>
    %21 = arith.maximumf %19, %20 : vector<32x128xf32>
    %c0_18 = arith.constant 0 : index
    %c0_19 = arith.constant 0 : index
    %22 = vector.load %arg8[%c0_18, %c0_19] : memref<32x1xf32, #tpu.memory_space<vmem>>, vector<32x1xf32>
    %c0_20 = arith.constant 0 : index
    %c0_21 = arith.constant 0 : index
    %23 = vector.load %arg9[%c0_20, %c0_21] : memref<1x1xf32, #tpu.memory_space<vmem>>, vector<1x1xf32>
    %24 = vector.broadcast %22 : vector<32x1xf32> to vector<32x128xf32>
    %25 = arith.mulf %21, %24 : vector<32x128xf32>
    %cst_22 = arith.constant dense<0.000000e+00> : vector<128xf32>
    %26 = vector.multi_reduction <add>, %25, %cst_22 [0] : vector<32x128xf32> to vector<128xf32>
    %27 = vector.shape_cast %26 : vector<128xf32> to vector<1x128xf32>
    %28 = vector.broadcast %23 : vector<1x1xf32> to vector<1x128xf32>
    %29 = arith.addf %27, %28 : vector<1x128xf32>
    %c0_23 = arith.constant 0 : index
    %c0_24 = arith.constant 0 : index
    %30 = vector.load %arg10[%c0_23, %c0_24] : memref<1x128xf32, #tpu.memory_space<vmem>>, vector<1x128xf32>
    tpu.vector_store %arg10[%c0_23, %c0_24], %29 {strides = array<i32>} : memref<1x128xf32, #tpu.memory_space<vmem>>, vector<1x128xf32>,
    return
  }
  func.func @transform_0(%arg0: i32) -> (i32, i32) {
    %c0_i32 = arith.constant 0 : i32
    %c0_i32_0 = arith.constant 0 : i32
    return %arg0, %c0_i32 : i32, i32
  }
  func.func @transform_1(%arg0: i32) -> (i32, i32) {
    %c0_i32 = arith.constant 0 : i32
    %c0_i32_0 = arith.constant 0 : i32
    %c0_i32_1 = arith.constant 0 : i32
    return %c0_i32, %c0_i32_0 : i32, i32
  }
  func.func @transform_2(%arg0: i32) -> (i32, i32) {
    %c0_i32 = arith.constant 0 : i32
    %c0_i32_0 = arith.constant 0 : i32
    %c0_i32_1 = arith.constant 0 : i32
    return %c0_i32, %c0_i32_0 : i32, i32
  }
  func.func @transform_3(%arg0: i32) -> (i32, i32) {
    %c0_i32 = arith.constant 0 : i32
    %c0_i32_0 = arith.constant 0 : i32
    %c0_i32_1 = arith.constant 0 : i32
    return %c0_i32, %c0_i32_0 : i32, i32
  }
  func.func @transform_4(%arg0: i32) -> (i32, i32) {
    %c0_i32 = arith.constant 0 : i32
    %c0_i32_0 = arith.constant 0 : i32
    %c0_i32_1 = arith.constant 0 : i32
    return %c0_i32, %c0_i32_0 : i32, i32
  }
  func.func @transform_5(%arg0: i32) -> (i32, i32) {
    %c0_i32 = arith.constant 0 : i32
    %c0_i32_0 = arith.constant 0 : i32
    %c0_i32_1 = arith.constant 0 : i32
    return %c0_i32, %c0_i32_0 : i32, i32
  }
  func.func @transform_6(%arg0: i32) -> (i32, i32) {
    %c0_i32 = arith.constant 0 : i32
    %c0_i32_0 = arith.constant 0 : i32
    %c0_i32_1 = arith.constant 0 : i32
    return %c0_i32, %c0_i32_0 : i32, i32
  }
  func.func @transform_7(%arg0: i32) -> (i32, i32) {
    %c0_i32 = arith.constant 0 : i32
    %c0_i32_0 = arith.constant 0 : i32
    %c0_i32_1 = arith.constant 0 : i32
    return %c0_i32, %c0_i32_0 : i32, i32
  }
  func.func @transform_8(%arg0: i32) -> (i32, i32) {
    %c0_i32 = arith.constant 0 : i32
    %c0_i32_0 = arith.constant 0 : i32
    %c0_i32_1 = arith.constant 0 : i32
    return %c0_i32, %c0_i32_0 : i32, i32
  }
  func.func @transform_9(%arg0: i32) -> (i32, i32) {
    %c0_i32 = arith.constant 0 : i32
    %c0_i32_0 = arith.constant 0 : i32
    return %c0_i32, %arg0 : i32, i32
  }
}

</mosaic_0001>

<bundles_post_ra>
// kernel: tpu_custom_call.1
= control target key start
LH: loop header
LB: loop body
LE: loop exit
PB: predicated region body
PF: predicated region fallthrough
CT: control target
= control target key end

     0   :  { %s4737_s0 = inlined_call_operand.vmem [shape: f32[128,4], index: 0, kind: input, shape index: {}]   ;;  %s4738_s1 = inlined_call_operand.vmem [shape: f32[4,32], index: 1, kind: input, shape index: {}]   ;;  %s4739_s2 = inlined_call_operand.vmem [shape: f32[1,32], index: 2, kind: input, shape index: {}]   ;;  %s4740_s3 = inlined_call_operand.vmem [shape: f32[32,32], index: 3, kind: input, shape index: {}]   ;;  %s4741_s4 = inlined_call_operand.vmem [shape: f32[32,1], index: 4, kind: input, shape index: {}]   ;;  %s4742_s5 = inlined_call_operand.vmem [shape: f32[32,32], index: 5, kind: input, shape index: {}]   ;;  %s4743_s6 = inlined_call_operand.vmem [shape: f32[32,1], index: 6, kind: input, shape index: {}]   ;;  %s4744_s7 = inlined_call_operand.vmem [shape: f32[32,1], index: 7, kind: input, shape index: {}]   ;;  %s4745_s8 = inlined_call_operand.<no memory space> [shape: f32[1,1], index: 8, kind: input, shape index: {}]   ;;  %s4746_s9 = inlined_call_operand.hbm [shape: f32[1,128], index: 9, kind: output, shape index: {}]  }
   0x1   :  { %v14_v0 = vstv %s4745_s8 }
   0x2   :  { %15 = vst [vmem:[#allocation2] sm:$0x1] %v14_v0 }
   0x3   :  { %v51_v1 = vld [vmem:[%s4738_s1] sm:$0xf]  ;;  %vm108_vm0 = vcmask 1043456   ;;  %vm59_vm1 = vcmask 31744   ;;  %v36_v3 = vld [vmem:[%s4737_s0 + $0x8] sm:$0xff]  ;;  %v37_v7 = vld [vmem:[%s4737_s0 + $0x10] sm:$0xff] }
   0x4   :  { %v35_v2 = vld [vmem:[%s4737_s0] sm:$0xff]  ;;  %v110_v4 = vsel %vm108_vm0, %v51_v1, 0  ;;  %v64_v6 = vsel %vm59_vm1, %v36_v3, 0  ;;  %v38_v8 = vld [vmem:[%s4737_s0 + $0x18] sm:$0xff]  ;;  %v67_v13 = vsel %vm59_vm1, %v37_v7, 0  ;;  %v40_v14 = vld [vmem:[%s4737_s0 + $0x28] sm:$0xff] }
   0x5   :  { %v61_v5 = vsel %vm59_vm1, %v35_v2, 0  ;;  %v39_v9 = vld [vmem:[%s4737_s0 + $0x20] sm:$0xff]  ;;  %v4029_v10 = vand.u32 4294901760, %v110_v4  ;;  %v4033_v12 = vand.u32 4294901760, %v64_v6  ;;  %v41_v15 = vld [vmem:[%s4737_s0 + $0x30] sm:$0xff]  ;;  %v4042_v16 = vand.u32 4294901760, %v67_v13 }
   0x6   :  { %v4031_v11 = vand.u32 4294901760, %v61_v5  ;;  %v70_v17 = vsel %vm59_vm1, %v38_v8, 0  ;;  %v73_v18 = vsel %vm59_vm1, %v39_v9, 0  ;;  %v76_v19 = vsel %vm59_vm1, %v40_v14, 0 }
   0x7   :  { %3074 = vmatprep.subr.mxu0 %v4029_v10  ;;  %v4052_v21 = vsub.f32 %v64_v6, %v4033_v12  ;;  %v4055_v22 = vsub.f32 %v110_v4, %v4029_v10  ;;  %v4057_v23 = vand.u32 4294901760, %v70_v17  ;;  %v4061_v24 = vsub.f32 %v67_v13, %v4042_v16 }
   0x8   :  { %v4049_v20 = vsub.f32 %v61_v5, %v4031_v11  ;;  %3075 = vmatpush3.msra.mxu0 %v4029_v10  ;;  %v4063_v25 = vand.u32 4294901760, %v73_v18  ;;  %v4065_v26 = vand.u32 4294901760, %v76_v19  ;;  %v79_v27 = vsel %vm59_vm1, %v41_v15, 0 }
   0x9   :  { %v190_v29 = vand.u32 4294901760, %v4052_v21  ;;  %v4071_v30 = vand.u32 4294901760, %v4055_v22  ;;  %v4074_v31 = vsub.f32 %v70_v17, %v4057_v23 }
   0xa   :  { %v180_v28 = vand.u32 4294901760, %v4049_v20 }
   0xb   :  { %16 = vsyncpa [#allocation4], 0  ;;  %v200_v32 = vand.u32 4294901760, %v4061_v24  ;;  %v4078_v33 = vsub.f32 %v73_v18, %v4063_v25  ;;  %v4081_v34 = vsub.f32 %v76_v19, %v4065_v26  ;;  %v4083_v35 = vand.u32 4294901760, %v79_v27  ;;  %v42_v44 = vld [vmem:[%s4737_s0 + $0x38] sm:$0xff]  ;;  %v43_v45 = vld [vmem:[%s4737_s0 + $0x40] sm:$0xff] }
   0xc   :  { %v181_v36 = vsub.f32 %v4049_v20, %v180_v28  ;;  %v191_v37 = vsub.f32 %v4052_v21, %v190_v29  ;;  %v342_v38 = vsub.f32 %v4055_v22, %v4071_v30  ;;  %v210_v39 = vand.u32 4294901760, %v4074_v31  ;;  %v44_v46 = vld [vmem:[%s4737_s0 + $0x48] sm:$0xff]  ;;  %v45_v55 = vld [vmem:[%s4737_s0 + $0x50] sm:$0xff]  ;;  %v46_v56 = vld [vmem:[%s4737_s0 + $0x58] sm:$0xff] }
   0xd   :  { %v201_v40 = vsub.f32 %v4061_v24, %v200_v32  ;;  %v220_v41 = vand.u32 4294901760, %v4078_v33  ;;  %v230_v42 = vand.u32 4294901760, %v4081_v34  ;;  %v4100_v43 = vsub.f32 %v79_v27, %v4083_v35  ;;  %v47_v1 = vld [vmem:[%s4737_s0 + $0x60] sm:$0xff]  ;;  %v48_v2 = vld [vmem:[%s4737_s0 + $0x68] sm:$0xff]  ;;  %v49_v14 = vld [vmem:[%s4737_s0 + $0x70] sm:$0xff] }
   0xe   :  { %v182_v47 = vand.u32 4294901760, %v181_v36  ;;  %v192_v48 = vand.u32 4294901760, %v191_v37  ;;  %v343_v49 = vand.u32 4294901760, %v342_v38  ;;  %v211_v50 = vsub.f32 %v4074_v31, %v210_v39 }
   0xf   :  { %v202_v51 = vand.u32 4294901760, %v201_v40  ;;  %v221_v52 = vsub.f32 %v4078_v33, %v220_v41  ;;  %v231_v53 = vsub.f32 %v4081_v34, %v230_v42  ;;  %v240_v54 = vand.u32 4294901760, %v4100_v43 }
  0x10   :  { %3076 = vmatprep.mubr.f32.mxu0 %v182_v47  ;;  %3100 = vmatprep.subr.mxu0 %v343_v49  ;;  %v212_v57 = vand.u32 4294901760, %v211_v50  ;;  %v82_v58 = vsel %vm59_vm1, %v42_v44, 0  ;;  %v85_v59 = vsel %vm59_vm1, %v43_v45, 0  ;;  %v88_v60 = vsel %vm59_vm1, %v44_v46, 0 }
  0x11   :  { %3077 = vmatmul.mubr.f32.vlgmr.msra.gmra.mrb[0].mxu0 %v192_v48  ;;  %v222_v61 = vand.u32 4294901760, %v221_v52  ;;  %v232_v62 = vand.u32 4294901760, %v231_v53  ;;  %v241_v63 = vsub.f32 %v4100_v43, %v240_v54  ;;  %v4133_v0 = vand.u32 4294901760, %v82_v58  ;;  %v50_v52 = vld [vmem:[%s4737_s0 + $0x78] sm:$0xff] }
  0x12   :  { %3101 = vmatpush3.msra.mxu0 %v343_v49  ;;  %3079 = vmatprep.mubr.f32.mxu0 %v202_v51  ;;  %v4141_v3 = vand.u32 4294901760, %v85_v59  ;;  %v4143_v4 = vand.u32 4294901760, %v88_v60  ;;  %v91_v5 = vsel %vm59_vm1, %v45_v55, 0  ;;  %v94_v6 = vsel %vm59_vm1, %v46_v56, 0 }
  0x13   :  { %v242_v7 = vand.u32 4294901760, %v241_v63  ;;  %v4148_v8 = vsub.f32 %v82_v58, %v4133_v0  ;;  %v4150_v9 = vand.u32 4294901760, %v91_v5  ;;  %v4152_v13 = vand.u32 4294901760, %v94_v6  ;;  %3126 = vmatprep.subr.mxu0 %v4055_v22 }
  0x14   :  { %v4159_v15 = vsub.f32 %v85_v59, %v4141_v3  ;;  %v4162_v17 = vsub.f32 %v88_v60, %v4143_v4  ;;  %v97_v18 = vsel %vm59_vm1, %v47_v1, 0  ;;  %v100_v19 = vsel %vm59_vm1, %v48_v2, 0 }
  0x15   :  { %3080 = vmatmul.mubr.f32.gmra.mrb[2].mxu0 %v212_v57  ;;  %v250_v27 = vand.u32 4294901760, %v4148_v8  ;;  %v4168_v36 = vsub.f32 %v91_v5, %v4150_v9  ;;  %v4171_v37 = vsub.f32 %v94_v6, %v4152_v13  ;;  %v4173_v38 = vand.u32 4294901760, %v97_v18 }
  0x16   :  { %3082 = vmatprep.mubr.f32.mxu0 %v222_v61  ;;  %v260_v40 = vand.u32 4294901760, %v4159_v15  ;;  %v270_v44 = vand.u32 4294901760, %v4162_v17  ;;  %v4177_v45 = vand.u32 4294901760, %v100_v19  ;;  %v103_v46 = vsel %vm59_vm1, %v49_v14, 0 }
  0x17   :  { %v251_v47 = vsub.f32 %v4148_v8, %v250_v27  ;;  %v280_v48 = vand.u32 4294901760, %v4168_v36  ;;  %v4185_v49 = vsub.f32 %v97_v18, %v4173_v38  ;;  %v4190_v51 = vand.u32 4294901760, %v103_v46 }
  0x18   :  { %v261_v50 = vsub.f32 %v4159_v15, %v260_v40  ;;  %v271_v55 = vsub.f32 %v4162_v17, %v270_v44  ;;  %v290_v56 = vand.u32 4294901760, %v4171_v37  ;;  %v4200_v57 = vsub.f32 %v100_v19, %v4177_v45 }
  0x19   :  { %3083 = vmatmul.mubr.f32.gmra.mrb[4].mxu0 %v232_v62  ;;  %v252_v53 = vand.u32 4294901760, %v251_v47  ;;  %v281_v59 = vsub.f32 %v4168_v36, %v280_v48  ;;  %v300_v60 = vand.u32 4294901760, %v4185_v49  ;;  %v4207_v61 = vsub.f32 %v103_v46, %v4190_v51 }
  0x1a   :  { %3085 = vmatprep.mubr.f32.mxu0 %v242_v7  ;;  %v262_v58 = vand.u32 4294901760, %v261_v50  ;;  %v106_v62 = vsel %vm59_vm1, %v50_v52, 0  ;;  %v272_v1 = vand.u32 4294901760, %v271_v55  ;;  %v291_v2 = vsub.f32 %v4171_v37, %v290_v56 }
  0x1b   :  { %v4210_v63 = vand.u32 4294901760, %v106_v62  ;;  %v310_v5 = vand.u32 4294901760, %v4200_v57  ;;  %v282_v6 = vand.u32 4294901760, %v281_v59  ;;  %v301_v7 = vsub.f32 %v4185_v49, %v300_v60 }
  0x1c   :  { %v320_v14 = vand.u32 4294901760, %v4207_v61  ;;  %v292_v19 = vand.u32 4294901760, %v291_v2  ;;  %vm1247_vm2 = vcmask 261120  }
  0x1d   :  { %3086 = vmatmul.mubr.f32.gmra.mrb[6].mxu0 %v252_v53  ;;  %v4221_v18 = vsub.f32 %v106_v62, %v4210_v63  ;;  %v311_v46 = vsub.f32 %v4200_v57, %v310_v5  ;;  %v302_v50 = vand.u32 4294901760, %v301_v7 }
  0x1e   :  { %3088 = vmatprep.mubr.f32.mxu0 %v262_v58  ;;  %v321_v52 = vsub.f32 %v4207_v61, %v320_v14 }
  0x1f   :  { %v330_v47 = vand.u32 4294901760, %v4221_v18  ;;  %v312_v53 = vand.u32 4294901760, %v311_v46 }
  0x20   :  { %v322_v58 = vand.u32 4294901760, %v321_v52 }
  0x21   :  { %3089 = vmatmul.mubr.f32.gmra.mrb[8].mxu0 %v272_v1  ;;  %v331_v55 = vsub.f32 %v4221_v18, %v330_v47 }
  0x22   :  { %3091 = vmatprep.mubr.f32.mxu0 %v282_v6 }
  0x23   :  { %v332_v59 = vand.u32 4294901760, %v331_v55 }
  0x25   :  { %3092 = vmatmul.mubr.f32.gmra.mrb[10].mxu0 %v292_v19 }
  0x26   :  { %3094 = vmatprep.mubr.f32.mxu0 %v302_v50 }
  0x29   :  { %3095 = vmatmul.mubr.f32.gmra.mrb[12].mxu0 %v312_v53 }
  0x2a   :  { %3097 = vmatprep.mubr.f32.mxu0 %v322_v58 }
  0x2d   :  { %3098 = vmatmul.mubr.f32.gmra.mrb[14].mxu0 %v332_v59 }
  0x2e   :  { %3102 = vmatprep.mubr.f32.mxu0 %v4031_v11 }
  0x31   :  { %3103 = vmatmul.mubr.f32.vlgmr.msra.gmra.mrb[0].mxu0 %v4033_v12 }
  0x32   :  { %3127 = vmatpush3.msra.mxu0 %v4055_v22  ;;  %3105 = vmatprep.mubr.f32.mxu0 %v4042_v16 }
  0x33   :  { %3152 = vmatprep.subr.mxu0 %v4029_v10 }
  0x35   :  { %3106 = vmatmul.mubr.f32.gmra.mrb[2].mxu0 %v4057_v23 }
  0x36   :  { %3108 = vmatprep.mubr.f32.mxu0 %v4063_v25 }
  0x39   :  { %3109 = vmatmul.mubr.f32.gmra.mrb[4].mxu0 %v4065_v26 }
  0x3a   :  { %3111 = vmatprep.mubr.f32.mxu0 %v4083_v35 }
  0x3d   :  { %3112 = vmatmul.mubr.f32.gmra.mrb[6].mxu0 %v4133_v0 }
  0x3e   :  { %3114 = vmatprep.mubr.f32.mxu0 %v4141_v3 }
  0x41   :  { %3115 = vmatmul.mubr.f32.gmra.mrb[8].mxu0 %v4143_v4 }
  0x42   :  { %3117 = vmatprep.mubr.f32.mxu0 %v4150_v9 }
  0x45   :  { %3118 = vmatmul.mubr.f32.gmra.mrb[10].mxu0 %v4152_v13 }
  0x46   :  { %3120 = vmatprep.mubr.f32.mxu0 %v4173_v38 }
  0x49   :  { %3121 = vmatmul.mubr.f32.gmra.mrb[12].mxu0 %v4177_v45 }
  0x4a   :  { %3123 = vmatprep.mubr.f32.mxu0 %v4190_v51 }
  0x4d   :  { %3124 = vmatmul.mubr.f32.gmra.mrb[14].mxu0 %v4210_v63 }
  0x4e   :  { %3128 = vmatprep.mubr.f32.mxu0 %v4049_v20 }
  0x51   :  { %3129 = vmatmul.mubr.f32.vlgmr.msra.gmra.mrb[0].mxu0 %v4052_v21 }
  0x52   :  { %3153 = vmatpush3.msra.mxu0 %v4029_v10  ;;  %3131 = vmatprep.mubr.f32.mxu0 %v4061_v24 }
  0x53   :  { %3178 = vmatprep.subr.mxu0 %v4071_v30 }
  0x55   :  { %3132 = vmatmul.mubr.f32.gmra.mrb[2].mxu0 %v4074_v31 }
  0x56   :  { %3134 = vmatprep.mubr.f32.mxu0 %v4078_v33 }
  0x59   :  { %3135 = vmatmul.mubr.f32.gmra.mrb[4].mxu0 %v4081_v34 }
  0x5a   :  { %3137 = vmatprep.mubr.f32.mxu0 %v4100_v43 }
  0x5d   :  { %3138 = vmatmul.mubr.f32.gmra.mrb[6].mxu0 %v4148_v8 }
  0x5e   :  { %3140 = vmatprep.mubr.f32.mxu0 %v4159_v15 }
  0x61   :  { %3141 = vmatmul.mubr.f32.gmra.mrb[8].mxu0 %v4162_v17 }
  0x62   :  { %3143 = vmatprep.mubr.f32.mxu0 %v4168_v36 }
  0x65   :  { %3144 = vmatmul.mubr.f32.gmra.mrb[10].mxu0 %v4171_v37 }
  0x66   :  { %3146 = vmatprep.mubr.f32.mxu0 %v4185_v49 }
  0x69   :  { %3147 = vmatmul.mubr.f32.gmra.mrb[12].mxu0 %v4200_v57 }
  0x6a   :  { %3149 = vmatprep.mubr.f32.mxu0 %v4207_v61 }
  0x6d   :  { %3150 = vmatmul.mubr.f32.gmra.mrb[14].mxu0 %v4221_v18 }
  0x6e   :  { %3154 = vmatprep.mubr.f32.mxu0 %v180_v28 }
  0x71   :  { %3155 = vmatmul.mubr.f32.vlgmr.msra.gmra.mrb[0].mxu0 %v190_v29 }
  0x72   :  { %3179 = vmatpush3.msra.mxu0 %v4071_v30  ;;  %3157 = vmatprep.mubr.f32.mxu0 %v200_v32 }
  0x73   :  { %3204 = vmatprep.subr.mxu0 %v4029_v10 }
  0x75   :  { %3158 = vmatmul.mubr.f32.gmra.mrb[2].mxu0 %v210_v39 }
  0x76   :  { %3160 = vmatprep.mubr.f32.mxu0 %v220_v41 }
  0x79   :  { %3161 = vmatmul.mubr.f32.gmra.mrb[4].mxu0 %v230_v42 }
  0x7a   :  { %3163 = vmatprep.mubr.f32.mxu0 %v240_v54 }
  0x7d   :  { %3164 = vmatmul.mubr.f32.gmra.mrb[6].mxu0 %v250_v27 }
  0x7e   :  { %3166 = vmatprep.mubr.f32.mxu0 %v260_v40 }
  0x81   :  { %3167 = vmatmul.mubr.f32.gmra.mrb[8].mxu0 %v270_v44 }
  0x82   :  { %3169 = vmatprep.mubr.f32.mxu0 %v280_v48 }
  0x85   :  { %3170 = vmatmul.mubr.f32.gmra.mrb[10].mxu0 %v290_v56 }
  0x86   :  { %3172 = vmatprep.mubr.f32.mxu0 %v300_v60 }
  0x89   :  { %3173 = vmatmul.mubr.f32.gmra.mrb[12].mxu0 %v310_v5 }
  0x8a   :  { %3175 = vmatprep.mubr.f32.mxu0 %v320_v14 }
  0x8d   :  { %3176 = vmatmul.mubr.f32.gmra.mrb[14].mxu0 %v330_v47 }
  0x8e   :  { %3180 = vmatprep.mubr.f32.mxu0 %v4031_v11 }
  0x91   :  { %3181 = vmatmul.mubr.f32.vlgmr.msra.gmra.mrb[0].mxu0 %v4033_v12 }
  0x92   :  { %3205 = vmatpush3.msra.mxu0 %v4029_v10  ;;  %3183 = vmatprep.mubr.f32.mxu0 %v4042_v16  ;;  %v1219_v10 = vld [vmem:[%s4740_s3] sm:$0xff] }
  0x95   :  { %3184 = vmatmul.mubr.f32.gmra.mrb[2].mxu0 %v4057_v23 }
  0x96   :  { %3186 = vmatprep.mubr.f32.mxu0 %v4063_v25 }
  0x99   :  { %3187 = vmatmul.mubr.f32.gmra.mrb[4].mxu0 %v4065_v26 }
  0x9a   :  { %3189 = vmatprep.mubr.f32.mxu0 %v4083_v35 }
  0x9d   :  { %3190 = vmatmul.mubr.f32.gmra.mrb[6].mxu0 %v4133_v0 }
  0x9e   :  { %3192 = vmatprep.mubr.f32.mxu0 %v4141_v3 }
  0xa1   :  { %3193 = vmatmul.mubr.f32.gmra.mrb[8].mxu0 %v4143_v4 }
  0xa2   :  { %3195 = vmatprep.mubr.f32.mxu0 %v4150_v9 }
  0xa5   :  { %3196 = vmatmul.mubr.f32.gmra.mrb[10].mxu0 %v4152_v13 }
  0xa6   :  { %3198 = vmatprep.mubr.f32.mxu0 %v4173_v38 }
  0xa9   :  { %3199 = vmatmul.mubr.f32.gmra.mrb[12].mxu0 %v4177_v45 }
  0xaa   :  { %3201 = vmatprep.mubr.f32.mxu0 %v4190_v51 }
  0xad   :  { %3202 = vmatmul.mubr.f32.gmra.mrb[14].mxu0 %v4210_v63 }
  0xae   :  { %3206 = vmatprep.mubr.f32.mxu0 %v4031_v11  ;;  %v4340_v11 = vsel %vm1247_vm2, %v1219_v10, 0 }
  0xb1   :  { %3207 = vmatmul.mubr.f32.vlgmr.msra.gmra.mrb[0].mxu0 %v4033_v12  ;;  %v4343_v12 = vand.u32 4294901760, %v4340_v11 }
  0xb2   :  { %3209 = vmatprep.mubr.f32.mxu0 %v4042_v16  ;;  %v4349_v16 = vld [vmem:[%s4739_s2] ss:$0 sm:$0xff] }
  0xb3   :  { %3300 = vmatprep.mubr.f32.mxu1 %v4343_v12 }
  0xb5   :  { %3210 = vmatmul.mubr.f32.gmra.mrb[2].mxu0 %v4057_v23 }
  0xb6   :  { %3212 = vmatprep.mubr.f32.mxu0 %v4063_v25 }
  0xb9   :  { %3213 = vmatmul.mubr.f32.gmra.mrb[4].mxu0 %v4065_v26 }
  0xba   :  { %3215 = vmatprep.mubr.f32.mxu0 %v4083_v35 }
  0xbd   :  { %3216 = vmatmul.mubr.f32.gmra.mrb[6].mxu0 %v4133_v0 }
  0xbe   :  { %3218 = vmatprep.mubr.f32.mxu0 %v4141_v3 }
  0xc1   :  { %3219 = vmatmul.mubr.f32.gmra.mrb[8].mxu0 %v4143_v4 }
  0xc2   :  { %3221 = vmatprep.mubr.f32.mxu0 %v4150_v9 }
  0xc5   :  { %3222 = vmatmul.mubr.f32.gmra.mrb[10].mxu0 %v4152_v13 }
  0xc6   :  { %3224 = vmatprep.mubr.f32.mxu0 %v4173_v38 }
  0xc9   :  { %3225 = vmatmul.mubr.f32.gmra.mrb[12].mxu0 %v4177_v45 }
  0xca   :  { %3227 = vmatprep.mubr.f32.mxu0 %v4190_v51 }
  0xcd   :  { %3228 = vmatmul.mubr.f32.gmra.mrb[14].mxu0 %v4210_v63 }
 0x184   :  { %v3208_v20 = vpop.f32.mrb[0].mxu0 }
 0x185   :  { %v3782_v21 = vadd.f32 %v3208_v20, %v4349_v16  ;;  %v1109_v22 = vpop.f32.mrb[1].mxu0 }
 0x186   :  { %v3783_v23 = vadd.f32 %v4349_v16, %v1109_v22 }
 0x187   :  { %v1204_v24 = vmax.f32 %v3782_v21, 0.0 }
 0x188   :  { %v1203_v25 = vmax.f32 %v3783_v23, 0.0  ;;  %v3211_v26 = vpop.f32.mrb[2].mxu0 }
 0x189   :  { %v1264_v28 = vsel %vm1247_vm2, %v1204_v24, 0  ;;  %v3784_v29 = vadd.f32 %v3211_v26, %v4349_v16  ;;  %v1121_v30 = vpop.f32.mrb[3].mxu0 }
 0x18a   :  { %v1312_v31 = vand.u32 4294901760, %v1264_v28  ;;  %v1261_v32 = vsel %vm1247_vm2, %v1203_v25, 0  ;;  %v3785_v33 = vadd.f32 %v4349_v16, %v1121_v30 }
 0x18b   :  { %v1309_v34 = vand.u32 4294901760, %v1261_v32  ;;  %v1206_v35 = vmax.f32 %v3784_v29, 0.0 }
 0x18c   :  { %v4357_v39 = vsub.f32 %v1264_v28, %v1312_v31  ;;  %v1205_v41 = vmax.f32 %v3785_v33, 0.0  ;;  %v3214_v42 = vpop.f32.mrb[4].mxu0 }
 0x18d   :  { %v4359_v43 = vpack.c.bf16 %v1312_v31, %v1309_v34  ;;  %v4361_v54 = vsub.f32 %v1261_v32, %v1309_v34  ;;  %v1270_v0 = vsel %vm1247_vm2, %v1206_v35, 0  ;;  %v3786_v3 = vadd.f32 %v3214_v42, %v4349_v16  ;;  %v1133_v4 = vpop.f32.mrb[5].mxu0 }
 0x18e   :  { %v1318_v8 = vand.u32 4294901760, %v1270_v0  ;;  %v1267_v9 = vsel %vm1247_vm2, %v1205_v41, 0  ;;  %v3787_v13 = vadd.f32 %v4349_v16, %v1133_v4  ;;  %v1439_v15 = vand.u32 4294901760, %v4357_v39 }
 0x18f   :  { %v1315_v17 = vand.u32 4294901760, %v1267_v9  ;;  %v1208_v27 = vmax.f32 %v3786_v3, 0.0  ;;  %3543 = vmatprep.subr.bf16.mxu0 %v4359_v43  ;;  %v1432_v36 = vand.u32 4294901760, %v4361_v54  ;;  %v4372_v37 = vpack.c.bf16 %v4357_v39, %v4361_v54 }
 0x190   :  { %v4374_v38 = vsub.f32 %v1270_v0, %v1318_v8  ;;  %v1207_v40 = vmax.f32 %v3787_v13, 0.0  ;;  %v3217_v44 = vpop.f32.mrb[6].mxu0  ;;  %3545 = vmatpush3.bf16.xpose.msra.mxu0 %v4359_v43  ;;  %v1440_v45 = vsub.f32 %v4357_v39, %v1439_v15 }
 0x191   :  { %v4380_v48 = vpack.c.bf16 %v1318_v8, %v1315_v17  ;;  %v4382_v49 = vsub.f32 %v1267_v9, %v1315_v17  ;;  %v1276_v51 = vsel %vm1247_vm2, %v1208_v27, 0  ;;  %v3788_v56 = vadd.f32 %v3217_v44, %v4349_v16  ;;  %v1145_v57 = vpop.f32.mrb[7].mxu0 }
 0x192   :  { %v1324_v60 = vand.u32 4294901760, %v1276_v51  ;;  %v1273_v61 = vsel %vm1247_vm2, %v1207_v40, 0  ;;  %v3789_v62 = vadd.f32 %v4349_v16, %v1145_v57  ;;  %v1433_v63 = vsub.f32 %v4361_v54, %v1432_v36 }
 0x193   :  { %v1321_v1 = vand.u32 4294901760, %v1273_v61  ;;  %v1210_v2 = vmax.f32 %v3788_v56, 0.0  ;;  %3547 = vmatprep.subr.bf16.mxu0 %v4380_v48  ;;  %v1441_v5 = vand.u32 4294901760, %v1440_v45  ;;  %v1446_v6 = vand.u32 4294901760, %v4382_v49 }
 0x194   :  { %v4393_v7 = vsub.f32 %v1276_v51, %v1324_v60  ;;  %v1209_v14 = vmax.f32 %v3789_v62, 0.0  ;;  %v3220_v18 = vpop.f32.mrb[8].mxu0  ;;  %v1434_v19 = vand.u32 4294901760, %v1433_v63  ;;  %v1453_v46 = vand.u32 4294901760, %v4374_v38 }
 0x195   :  { %v4396_v47 = vpack.c.bf16 %v1324_v60, %v1321_v1  ;;  %v4398_v50 = vsub.f32 %v1273_v61, %v1321_v1  ;;  %v1282_v52 = vsel %vm1247_vm2, %v1210_v2, 0  ;;  %v3790_v53 = vadd.f32 %v3220_v18, %v4349_v16  ;;  %v1157_v55 = vpop.f32.mrb[9].mxu0 }
 0x196   :  { %v1330_v58 = vand.u32 4294901760, %v1282_v52  ;;  %v1279_v59 = vsel %vm1247_vm2, %v1209_v14, 0  ;;  %v3791_v10 = vadd.f32 %v4349_v16, %v1157_v55  ;;  %v3574_v20 = vpack.c.bf16 %v1441_v5, %v1434_v19 }
 0x197   :  { %v1327_v21 = vand.u32 4294901760, %v1279_v59  ;;  %v1212_v22 = vmax.f32 %v3790_v53, 0.0  ;;  %v1447_v23 = vsub.f32 %v4382_v49, %v1446_v6  ;;  %v1454_v24 = vsub.f32 %v4374_v38, %v1453_v46 }
 0x198   :  { %v4410_v25 = vsub.f32 %v1282_v52, %v1330_v58  ;;  %v1211_v26 = vmax.f32 %v3791_v10, 0.0  ;;  %3575 = vmatprep.subr.bf16.mxu1 %v3574_v20  ;;  %v3223_v28 = vpop.f32.mrb[10].mxu0  ;;  %3549 = vmatpush3.bf16.xpose.msra.mxu0 %v4380_v48  ;;  %v1460_v29 = vand.u32 4294901760, %v4398_v50  ;;  %v1467_v30 = vand.u32 4294901760, %v4393_v7 }
 0x199   :  { %v4415_v31 = vpack.c.bf16 %v1330_v58, %v1327_v21  ;;  %v4417_v32 = vsub.f32 %v1279_v59, %v1327_v21  ;;  %v1288_v33 = vsel %vm1247_vm2, %v1212_v22, 0  ;;  %v3792_v34 = vadd.f32 %v3223_v28, %v4349_v16  ;;  %3577 = vmatpush3.bf16.xpose.msra.mxu1 %v3574_v20  ;;  %v1169_v35 = vpop.f32.mrb[11].mxu0  ;;  %3551 = vmatprep.subr.bf16.mxu0 %v4396_v47 }
 0x19a   :  { %v1336_v41 = vand.u32 4294901760, %v1288_v33  ;;  %v1285_v42 = vsel %vm1247_vm2, %v1211_v26, 0  ;;  %v3793_v0 = vadd.f32 %v4349_v16, %v1169_v35  ;;  %v1448_v3 = vand.u32 4294901760, %v1447_v23 }
 0x19b   :  { %v1333_v4 = vand.u32 4294901760, %v1285_v42  ;;  %v1214_v8 = vmax.f32 %v3792_v34, 0.0  ;;  %v1455_v9 = vand.u32 4294901760, %v1454_v24  ;;  %v1461_v13 = vsub.f32 %v4398_v50, %v1460_v29 }
 0x19c   :  { %v4427_v17 = vsub.f32 %v1288_v33, %v1336_v41  ;;  %v1213_v27 = vmax.f32 %v3793_v0, 0.0  ;;  %v3226_v40 = vpop.f32.mrb[12].mxu0  ;;  %v1468_v44 = vsub.f32 %v4393_v7, %v1467_v30  ;;  %v1474_v45 = vand.u32 4294901760, %v4417_v32 }
 0x19d   :  { %v4433_v51 = vpack.c.bf16 %v1336_v41, %v1333_v4  ;;  %v4435_v56 = vsub.f32 %v1285_v42, %v1333_v4  ;;  %v1294_v57 = vsel %vm1247_vm2, %v1214_v8, 0  ;;  %v3578_v60 = vpack.c.bf16 %v1455_v9, %v1448_v3  ;;  %v1181_v61 = vpop.f32.mrb[13].mxu0 }
 0x19e   :  { %v1342_v62 = vand.u32 4294901760, %v1294_v57  ;;  %v1291_v63 = vsel %vm1247_vm2, %v1213_v27, 0  ;;  %v3794_v1 = vadd.f32 %v3226_v40, %v4349_v16  ;;  %v3795_v2 = vadd.f32 %v4349_v16, %v1181_v61 }
 0x19f   :  { %v1339_v5 = vand.u32 4294901760, %v1291_v63  ;;  %3579 = vmatprep.subr.bf16.mxu1 %v3578_v60  ;;  %v1462_v14 = vand.u32 4294901760, %v1461_v13  ;;  %v1469_v18 = vand.u32 4294901760, %v1468_v44  ;;  %v1475_v19 = vsub.f32 %v4417_v32, %v1474_v45 }
 0x1a0   :  { %v4444_v52 = vsub.f32 %v1294_v57, %v1342_v62  ;;  %v1216_v53 = vmax.f32 %v3794_v1, 0.0  ;;  %v1215_v55 = vmax.f32 %v3795_v2, 0.0  ;;  %v3229_v58 = vpop.f32.mrb[14].mxu0  ;;  %3553 = vmatpush3.bf16.xpose.msra.mxu0 %v4396_v47  ;;  %v1481_v59 = vand.u32 4294901760, %v4410_v25 }
 0x1a1   :  { %v4448_v10 = vpack.c.bf16 %v1342_v62, %v1339_v5  ;;  %v4450_v20 = vsub.f32 %v1291_v63, %v1339_v5  ;;  %v3796_v21 = vadd.f32 %v3229_v58, %v4349_v16  ;;  %3581 = vmatpush3.bf16.xpose.msra.mxu1 %v3578_v60  ;;  %v1193_v22 = vpop.f32.mrb[15].mxu0  ;;  %3555 = vmatprep.subr.bf16.mxu0 %v4415_v31  ;;  %v1476_v23 = vand.u32 4294901760, %v1475_v19 }
 0x1a2   :  { %v1300_v24 = vsel %vm1247_vm2, %v1216_v53, 0  ;;  %v1297_v26 = vsel %vm1247_vm2, %v1215_v55, 0  ;;  %v3797_v28 = vadd.f32 %v4349_v16, %v1193_v22  ;;  %v3582_v33 = vpack.c.bf16 %v1469_v18, %v1462_v14 }
 0x1a3   :  { %v1348_v34 = vand.u32 4294901760, %v1300_v24  ;;  %v1345_v35 = vand.u32 4294901760, %v1297_v26  ;;  %v1218_v41 = vmax.f32 %v3796_v21, 0.0  ;;  %v1482_v42 = vsub.f32 %v4410_v25, %v1481_v59 }
 0x1a4   :  { %v1217_v0 = vmax.f32 %v3797_v28, 0.0  ;;  %3583 = vmatprep.subr.bf16.mxu1 %v3582_v33  ;;  %v1488_v3 = vand.u32 4294901760, %v4435_v56  ;;  %v1495_v4 = vand.u32 4294901760, %v4427_v17  ;;  %v1502_v8 = vand.u32 4294901760, %v4450_v20 }
 0x1a5   :  { %v1522_v9 = vsub.f32 %v1300_v24, %v1348_v34  ;;  %v4463_v13 = vpack.c.bf16 %v1348_v34, %v1345_v35  ;;  %v1515_v16 = vsub.f32 %v1297_v26, %v1345_v35  ;;  %v1306_v27 = vsel %vm1247_vm2, %v1218_v41, 0 }
 0x1a6   :  { %v1354_v40 = vand.u32 4294901760, %v1306_v27  ;;  %v1303_v44 = vsel %vm1247_vm2, %v1217_v0, 0  ;;  %v1483_v57 = vand.u32 4294901760, %v1482_v42  ;;  %v1489_v60 = vsub.f32 %v4435_v56, %v1488_v3 }
 0x1a7   :  { %v1351_v61 = vand.u32 4294901760, %v1303_v44  ;;  %v1496_v62 = vsub.f32 %v4427_v17, %v1495_v4  ;;  %v1503_v63 = vsub.f32 %v4450_v20, %v1502_v8  ;;  %v1509_v1 = vand.u32 4294901760, %v4444_v52 }
 0x1a8   :  { %v1536_v2 = vsub.f32 %v1306_v27, %v1354_v40  ;;  %3557 = vmatpush3.bf16.xpose.msra.mxu0 %v4415_v31  ;;  %v3586_v5 = vpack.c.bf16 %v1483_v57, %v1476_v23  ;;  %v1490_v14 = vand.u32 4294901760, %v1489_v60  ;;  %v1516_v18 = vand.u32 4294901760, %v1515_v16 }
 0x1a9   :  { %v4472_v19 = vpack.c.bf16 %v1354_v40, %v1351_v61  ;;  %v1529_v53 = vsub.f32 %v1303_v44, %v1351_v61  ;;  %3585 = vmatpush3.bf16.xpose.msra.mxu1 %v3582_v33  ;;  %3559 = vmatprep.subr.bf16.mxu0 %v4433_v51  ;;  %v1497_v55 = vand.u32 4294901760, %v1496_v62  ;;  %v1504_v58 = vand.u32 4294901760, %v1503_v63 }
 0x1aa   :  { %3587 = vmatprep.subr.bf16.mxu1 %v3586_v5  ;;  %v1510_v21 = vsub.f32 %v4444_v52, %v1509_v1  ;;  %v1517_v22 = vsub.f32 %v1515_v16, %v1516_v18  ;;  %v1523_v24 = vand.u32 4294901760, %v1522_v9  ;;  %v1537_v26 = vand.u32 4294901760, %v1536_v2 }
 0x1ab   :  { %v3590_v28 = vpack.c.bf16 %v1497_v55, %v1490_v14  ;;  %v1530_v34 = vand.u32 4294901760, %v1529_v53  ;;  %v3610_v23 = vpack.c.bf16 %v4374_v38, %v4382_v49  ;;  %v3614_v35 = vpack.c.bf16 %v4393_v7, %v4398_v50  ;;  %v1220_v49 = vld [vmem:[%s4740_s3 + $0x8] sm:$0xff]  ;;  %v1222_v50 = vld [vmem:[%s4740_s3 + $0x18] sm:$0xff] }
 0x1ac   :  { %v1511_v41 = vand.u32 4294901760, %v1510_v21  ;;  %v1518_v33 = vand.u32 4294901760, %v1517_v22  ;;  %v1524_v42 = vsub.f32 %v1522_v9, %v1523_v24  ;;  %v1538_v0 = vsub.f32 %v1536_v2, %v1537_v26 }
 0x1ad   :  { %v1531_v27 = vsub.f32 %v1529_v53, %v1530_v34  ;;  %v3618_v40 = vpack.c.bf16 %v4410_v25, %v4417_v32  ;;  %v3622_v44 = vpack.c.bf16 %v4427_v17, %v4435_v56  ;;  %v3626_v57 = vpack.c.bf16 %v4444_v52, %v4450_v20 }
 0x1ae   :  { %v3594_v60 = vpack.c.bf16 %v1511_v41, %v1504_v58  ;;  %v1525_v61 = vand.u32 4294901760, %v1524_v42  ;;  %v1539_v62 = vand.u32 4294901760, %v1538_v0  ;;  %v3630_v63 = vpack.c.bf16 %v1522_v9, %v1515_v16  ;;  %v2087_v41 = vld [vmem:[%s4743_s6 + $0x8] sm:$0xff]  ;;  %v2089_v42 = vld [vmem:[%s4743_s6 + $0x18] sm:$0xff]  ;;  %v2740_v0 = vld [vmem:[%s4744_s7] sm:$0xff] }
 0x1af   :  { %v1532_v14 = vand.u32 4294901760, %v1531_v27  ;;  %v3634_v55 = vpack.c.bf16 %v1536_v2, %v1529_v53  ;;  %v4492_v17 = vpack.c.bf16 %v1439_v15, %v1432_v36  ;;  %v4498_v56 = vpack.c.bf16 %v1453_v46, %v1446_v6  ;;  %v1221_v6 = vld [vmem:[%s4740_s3 + $0x10] sm:$0xff]  ;;  %v2741_v27 = vld [vmem:[%s4744_s7 + $0x8] sm:$0xff] }
 0x1b0   :  { %3561 = vmatpush3.bf16.xpose.msra.mxu0 %v4433_v51  ;;  %v3598_v21 = vpack.c.bf16 %v1525_v61, %v1518_v33  ;;  %v4504_v52 = vpack.c.bf16 %v1467_v30, %v1460_v29  ;;  %v4510_v39 = vpack.c.bf16 %v1481_v59, %v1474_v45  ;;  %v4512_v54 = vpack.c.bf16 %v1495_v4, %v1488_v3  ;;  %v2088_v33 = vld [vmem:[%s4743_s6 + $0x10] sm:$0xff] }
 0x1b1   :  { %3589 = vmatpush3.bf16.xpose.msra.mxu1 %v3586_v5  ;;  %3563 = vmatprep.subr.bf16.mxu0 %v4448_v10  ;;  %v3602_v22 = vpack.c.bf16 %v1539_v62, %v1532_v14  ;;  %v4514_v15 = vpack.c.bf16 %v1509_v1, %v1502_v8  ;;  %v4516_v36 = vpack.c.bf16 %v1523_v24, %v1516_v18  ;;  %v1252_v7 = vsel %vm1247_vm2, %v1220_v49, 0  ;;  %v1223_v24 = vld [vmem:[%s4741_s4] sm:$0xff]  ;;  %v2083_v62 = vld [vmem:[%s4742_s5 + $0x8] sm:$0xff]  ;;  %v2084_v14 = vld [vmem:[%s4742_s5 + $0x10] sm:$0xff] }
 0x1b2   :  { %3591 = vmatprep.subr.bf16.mxu1 %v3590_v28  ;;  %v4518_v38 = vpack.c.bf16 %v1537_v26, %v1530_v34  ;;  %v1255_v46 = vsel %vm1247_vm2, %v1221_v6, 0  ;;  %v4537_v25 = vand.u32 4294901760, %v1252_v7  ;;  %v1258_v30 = vsel %vm1247_vm2, %v1222_v50, 0  ;;  %v1225_v26 = vld [vmem:[%s4741_s4 + $0x10] sm:$0xff]  ;;  %v1224_v34 = vld [vmem:[%s4741_s4 + $0x8] sm:$0xff] }
 0x1b3   :  { %v4539_v29 = vand.u32 4294901760, %v1255_v46  ;;  %v4543_v32 = vand.u32 4294901760, %v1258_v30  ;;  %v1390_v45 = vsub.f32 %v4340_v11, %v4343_v12 }
 0x1b4   :  { %v1400_v11 = vsub.f32 %v1252_v7, %v4537_v25 }
 0x1b5   :  { %v1420_v59 = vsub.f32 %v1258_v30, %v4543_v32  ;;  %v1391_v20 = vand.u32 4294901760, %v1390_v45 }
 0x1b6   :  { %v1401_v8 = vand.u32 4294901760, %v1400_v11 }
 0x1b7   :  { %v1392_v3 = vsub.f32 %v1390_v45, %v1391_v20  ;;  %v1421_v16 = vand.u32 4294901760, %v1420_v59 }
 0x1b8   :  { %3565 = vmatpush3.bf16.xpose.msra.mxu0 %v4448_v10  ;;  %v1402_v1 = vsub.f32 %v1400_v11, %v1401_v8 }
 0x1b9   :  { %3593 = vmatpush3.bf16.xpose.msra.mxu1 %v3590_v28  ;;  %3567 = vmatprep.subr.bf16.mxu0 %v4463_v13  ;;  %v1393_v4 = vand.u32 4294901760, %v1392_v3  ;;  %v1422_v5 = vsub.f32 %v1420_v59, %v1421_v16  ;;  %v3954_v28 = vmov 0  }
 0x1ba   :  { %3595 = vmatprep.subr.bf16.mxu1 %v3594_v60  ;;  %v1403_v18 = vand.u32 4294901760, %v1402_v1  ;;  %3928 = vset.pattern.permute.xlu0 %v3954_v28 }
 0x1bb   :  { %3262 = vmatprep.mubr.f32.mxu0 %v1393_v4  ;;  %v1423_v58 = vand.u32 4294901760, %v1422_v5  ;;  %1229 = vperm.xlu0 %3928, %v1223_v24  }
 0x1bc   :  { %3929 = vset.pattern.permute.xlu1 %v3954_v28 }
 0x1bd   :  { %1239 = vperm.xlu1 %3929, %v1225_v26  }
 0x1bf   :  { %1234 = vperm.xlu0 %3928, %v1224_v34  }
 0x1c0   :  { %3569 = vmatpush3.bf16.xpose.msra.mxu0 %v4463_v13 }
 0x1c1   :  { %3597 = vmatpush3.bf16.xpose.msra.mxu1 %v3594_v60  ;;  %3571 = vmatprep.subr.bf16.mxu0 %v4472_v19 }
 0x1c2   :  { %3599 = vmatprep.subr.bf16.mxu1 %v3598_v21 }
 0x1c8   :  { %3573 = vmatpush3.bf16.xpose.msra.mxu0 %v4472_v19 }
 0x1c9   :  { %3601 = vmatpush3.bf16.xpose.msra.mxu1 %v3598_v21 }
 0x1ca   :  { %3603 = vmatprep.subr.bf16.mxu1 %v3602_v22 }
 0x1cf   :  { %3263 = vmatmul.mubr.f32.vlgmr.msra.gmra.mrb[16].mxu0 %v1403_v18 }
 0x1d1   :  { %3605 = vmatpush3.bf16.xpose.msra.mxu1 %v3602_v22  ;;  %v2117_v22 = vsel %vm1247_vm2, %v2084_v14, 0 }
 0x1d2   :  { %3607 = vmatprep.subr.bf16.mxu1 %v4372_v37 }
 0x1d8   :  { %3301 = vmatmul.mubr.f32.vlgmr.msra.gmra.mrb[0].mxu1 %v4537_v25 }
 0x1d9   :  { %3609 = vmatpush3.bf16.xpose.msra.mxu1 %v4372_v37  ;;  %3303 = vmatprep.mubr.f32.mxu1 %v4539_v29  ;;  %v1410_v37 = vsub.f32 %v1255_v46, %v4539_v29 }
 0x1da   :  { %3611 = vmatprep.subr.bf16.mxu1 %v3610_v23 }
 0x1db   :  { %v1411_v9 = vand.u32 4294901760, %v1410_v37 }
 0x1dc   :  { %3304 = vmatmul.mubr.f32.gmra.mrb[2].mxu1 %v4543_v32 }
 0x1dd   :  { %3338 = vmatprep.mubr.f32.mxu1 %v1390_v45  ;;  %v1412_v2 = vsub.f32 %v1410_v37, %v1411_v9 }
 0x1df   :  { %v1413_v53 = vand.u32 4294901760, %v1412_v2 }
 0x1e1   :  { %3613 = vmatpush3.bf16.xpose.msra.mxu1 %v3610_v23  ;;  %3265 = vmatprep.mubr.f32.mxu0 %v1413_v53  ;;  %v1226_v23 = vld [vmem:[%s4741_s4 + $0x18] sm:$0xff] }
 0x1e2   :  { %3615 = vmatprep.subr.bf16.mxu1 %v3614_v35  ;;  %3266 = vmatmul.mubr.f32.gmra.mrb[18].mxu0 %v1423_v58 }
 0x1e3   :  { %1244 = vperm.xlu1 %3929, %v1226_v23  }
 0x1e7   :  { %2097 = vperm.xlu1 %3929, %v2087_v41  }
 0x1e9   :  { %3617 = vmatpush3.bf16.xpose.msra.mxu1 %v3614_v35  ;;  %v2086_v35 = vld [vmem:[%s4743_s6] sm:$0xff] }
 0x1ea   :  { %3619 = vmatprep.subr.bf16.mxu1 %v3618_v40  ;;  %2092 = vperm.xlu0 %3928, %v2086_v35  }
 0x1eb   :  { %2107 = vperm.xlu1 %3929, %v2089_v42  }
 0x1ee   :  { %2102 = vperm.xlu0 %3928, %v2088_v33  }
 0x1ef   :  { %2752 = vperm.xlu1 %3929, %v2741_v27  }
 0x1f1   :  { %3621 = vmatpush3.bf16.xpose.msra.mxu1 %v3618_v40  ;;  %v2742_v40 = vld [vmem:[%s4744_s7 + $0x10] sm:$0xff] }
 0x1f2   :  { %3623 = vmatprep.subr.bf16.mxu1 %v3622_v44  ;;  %2747 = vperm.xlu0 %3928, %v2740_v0  }
 0x1f6   :  { %2757 = vperm.xlu0 %3928, %v2742_v40  }
 0x1f9   :  { %3625 = vmatpush3.bf16.xpose.msra.mxu1 %v3622_v44  ;;  %v2743_v44 = vld [vmem:[%s4744_s7 + $0x18] sm:$0xff] }
 0x1fa   :  { %3627 = vmatprep.subr.bf16.mxu1 %v3626_v57  ;;  %2762 = vperm.xlu1 %3929, %v2743_v44  }
 0x201   :  { %3629 = vmatpush3.bf16.xpose.msra.mxu1 %v3626_v57  ;;  %v2744_v57 = vld [vmem:[#allocation2] sm:$0x1] }
 0x202   :  { %3631 = vmatprep.subr.bf16.mxu1 %v3630_v63  ;;  %2780 = vperm.xlu0 %3928, %v2744_v57  }
 0x209   :  { %3633 = vmatpush3.bf16.xpose.msra.mxu1 %v3630_v63 }
 0x20a   :  { %3635 = vmatprep.subr.bf16.mxu1 %v3634_v55 }
 0x211   :  { %3637 = vmatpush3.bf16.xpose.msra.mxu1 %v3634_v55  ;;  %v2114_v55 = vsel %vm1247_vm2, %v2083_v62, 0 }
 0x212   :  { %3639 = vmatprep.subr.bf16.mxu1 %v4359_v43 }
 0x218   :  { %3339 = vmatmul.mubr.f32.vlgmr.msra.gmra.mrb[0].mxu1 %v1400_v11 }
 0x219   :  { %3641 = vmatpush3.bf16.xpose.msra.mxu1 %v4359_v43  ;;  %3341 = vmatprep.mubr.f32.mxu1 %v1410_v37 }
 0x21a   :  { %3643 = vmatprep.subr.bf16.mxu1 %v4380_v48 }
 0x21c   :  { %3342 = vmatmul.mubr.f32.gmra.mrb[2].mxu1 %v1420_v59 }
 0x21d   :  { %3376 = vmatprep.mubr.f32.mxu1 %v1391_v20 }
 0x221   :  { %3645 = vmatpush3.bf16.xpose.msra.mxu1 %v4380_v48 }
 0x222   :  { %3647 = vmatprep.subr.bf16.mxu1 %v4396_v47 }
 0x229   :  { %3649 = vmatpush3.bf16.xpose.msra.mxu1 %v4396_v47 }
 0x22a   :  { %3651 = vmatprep.subr.bf16.mxu1 %v4415_v31 }
 0x231   :  { %3653 = vmatpush3.bf16.xpose.msra.mxu1 %v4415_v31 }
 0x232   :  { %3655 = vmatprep.subr.bf16.mxu1 %v4433_v51 }
 0x239   :  { %3657 = vmatpush3.bf16.xpose.msra.mxu1 %v4433_v51 }
 0x23a   :  { %3659 = vmatprep.subr.bf16.mxu1 %v4448_v10  ;;  %v1230_v63 = vpop.permute.xlu0 %1229 }
 0x23c   :  { %v1240_v21 = vpop.permute.xlu1 %1239 }
 0x241   :  { %3661 = vmatpush3.bf16.xpose.msra.mxu1 %v4448_v10 }
 0x242   :  { %3663 = vmatprep.subr.bf16.mxu1 %v4463_v13 }
 0x249   :  { %3665 = vmatpush3.bf16.xpose.msra.mxu1 %v4463_v13 }
 0x24a   :  { %3667 = vmatprep.subr.bf16.mxu1 %v4472_v19 }
 0x251   :  { %3669 = vmatpush3.bf16.xpose.msra.mxu1 %v4472_v19 }
 0x252   :  { %3671 = vmatprep.subr.bf16.mxu1 %v4492_v17 }
 0x258   :  { %3377 = vmatmul.mubr.f32.vlgmr.msra.gmra.mrb[0].mxu1 %v1401_v8 }
 0x259   :  { %3673 = vmatpush3.bf16.xpose.msra.mxu1 %v4492_v17  ;;  %3379 = vmatprep.mubr.f32.mxu1 %v1411_v9  ;;  %v2085_v17 = vld [vmem:[%s4742_s5 + $0x18] sm:$0xff] }
 0x25a   :  { %3675 = vmatprep.subr.bf16.mxu1 %v4498_v56 }
 0x25c   :  { %3380 = vmatmul.mubr.f32.gmra.mrb[2].mxu1 %v1421_v16 }
 0x25d   :  { %3414 = vmatprep.mubr.f32.mxu1 %v4343_v12 }
 0x261   :  { %3677 = vmatpush3.bf16.xpose.msra.mxu1 %v4498_v56  ;;  %v4669_v56 = vand.u32 4294901760, %v2114_v55 }
 0x262   :  { %3679 = vmatprep.subr.bf16.mxu1 %v4504_v52  ;;  %v1245_v46 = vpop.permute.xlu1 %1244 }
 0x263   :  { %v4675_v7 = vsub.f32 %v2114_v55, %v4669_v56 }
 0x265   :  { %v2203_v4 = vand.u32 4294901760, %v4675_v7 }
 0x267   :  { %v2204_v28 = vsub.f32 %v4675_v7, %v2203_v4 }
 0x269   :  { %3681 = vmatpush3.bf16.xpose.msra.mxu1 %v4504_v52  ;;  %v1235_v52 = vpop.permute.xlu0 %1234 }
 0x26a   :  { %3683 = vmatprep.subr.bf16.mxu1 %v4510_v39 }
 0x271   :  { %3685 = vmatpush3.bf16.xpose.msra.mxu1 %v4510_v39 }
 0x272   :  { %3687 = vmatprep.subr.bf16.mxu1 %v4512_v54 }
 0x279   :  { %3689 = vmatpush3.bf16.xpose.msra.mxu1 %v4512_v54  ;;  %v4671_v54 = vand.u32 4294901760, %v2117_v22 }
 0x27a   :  { %3691 = vmatprep.subr.bf16.mxu1 %v4514_v15 }
 0x281   :  { %3693 = vmatpush3.bf16.xpose.msra.mxu1 %v4514_v15  ;;  %v2120_v15 = vsel %vm1247_vm2, %v2085_v17, 0 }
 0x282   :  { %3695 = vmatprep.subr.bf16.mxu1 %v4516_v36 }
 0x289   :  { %3697 = vmatpush3.bf16.xpose.msra.mxu1 %v4516_v36 }
 0x28a   :  { %3699 = vmatprep.subr.bf16.mxu1 %v4518_v38 }
 0x291   :  { %3701 = vmatpush3.bf16.xpose.msra.mxu1 %v4518_v38 }
 0x292   :  { %3703 = vmatprep.subr.bf16.mxu1 %v4359_v43 }
 0x298   :  { %3415 = vmatmul.mubr.f32.vlgmr.msra.gmra.mrb[0].mxu1 %v4537_v25 }
 0x299   :  { %3705 = vmatpush3.bf16.xpose.msra.mxu1 %v4359_v43  ;;  %3417 = vmatprep.mubr.f32.mxu1 %v4539_v29 }
 0x29a   :  { %3707 = vmatprep.subr.bf16.mxu1 %v4380_v48 }
 0x29c   :  { %3418 = vmatmul.mubr.f32.gmra.mrb[2].mxu1 %v4543_v32 }
 0x29d   :  { %3452 = vmatprep.mubr.f32.mxu1 %v4343_v12 }
 0x2a1   :  { %3709 = vmatpush3.bf16.xpose.msra.mxu1 %v4380_v48 }
 0x2a2   :  { %3711 = vmatprep.subr.bf16.mxu1 %v4396_v47  ;;  %v3264_v12 = vpop.f32.mrb[16].mxu0 }
 0x2a3   :  { %v1395_v43 = vpop.f32.mrb[17].mxu0  ;;  %v1406_v39 = vadd.f32 %v3264_v12, %v1235_v52 }
 0x2a4   :  { %v1396_v36 = vadd.f32 %v1395_v43, %v1230_v63  ;;  %v2205_v43 = vand.u32 4294901760, %v2204_v28 }
 0x2a9   :  { %3713 = vmatpush3.bf16.xpose.msra.mxu1 %v4396_v47 }
 0x2aa   :  { %3715 = vmatprep.subr.bf16.mxu1 %v4415_v31 }
 0x2b1   :  { %3717 = vmatpush3.bf16.xpose.msra.mxu1 %v4415_v31  ;;  %v2082_v31 = vld [vmem:[%s4742_s5] sm:$0xff]  ;;  %s3955_s5 = smov [#allocation3]  }
 0x2b2   :  { %3719 = vmatprep.subr.bf16.mxu1 %v4433_v51  ;;  %s2795_s30 = sshll.u32 %s3955_s5, 4  ;;  %s2796_s30 = int_to_ptr.vmem [resolvable:$true] %s2795_s30 }
 0x2b3   :  { %s3930_s10 = scalar_lea.vmem %s2796_s30, 16  ;;  %s3934_s11 = scalar_lea.vmem %s2796_s30, 32 }
 0x2b4   :  { %p3931_p0 = scmp.ne.s32.totalorder %s2796_s30, %s3930_s10  ;;  %p3935_p1 = scmp.lt.s32.totalorder %s2796_s30, %s2796_s30 }
 0x2b5   :  { %v3267_v48 = vpop.f32.mrb[18].mxu0  ;;  %p3936_p2 = scmp.lt.s32.totalorder %s3934_s11, %s3930_s10 }
 0x2b6   :  { %v1415_v47 = vpop.f32.mrb[19].mxu0 }
 0x2b7   :  { %v1416_v45 = vadd.f32 %v1415_v47, %v1240_v21  ;;  %p3937_p3 = por %p3936_p2, %p3935_p1 }
 0x2b9   :  { %3721 = vmatpush3.bf16.xpose.msra.mxu1 %v4433_v51  ;;  %v2111_v51 = vsel %vm1247_vm2, %v2082_v31, 0  ;;  %p3938_p4 = pnand %p3937_p3, %p3931_p0 }
 0x2ba   :  { %3723 = vmatprep.subr.bf16.mxu1 %v4448_v10 }
 0x2c1   :  { %3725 = vmatpush3.bf16.xpose.msra.mxu1 %v4448_v10  ;;  %v4649_v10 = vand.u32 4294901760, %v2111_v51 }
 0x2c2   :  { %3727 = vmatprep.subr.bf16.mxu1 %v4463_v13 }
 0x2c9   :  { %3729 = vmatpush3.bf16.xpose.msra.mxu1 %v4463_v13  ;;  %v4652_v13 = vsub.f32 %v2111_v51, %v4649_v10 }
 0x2ca   :  { %3731 = vmatprep.subr.bf16.mxu1 %v4472_v19 }
 0x2d1   :  { %3733 = vmatpush3.bf16.xpose.msra.mxu1 %v4472_v19  ;;  %v2193_v19 = vand.u32 4294901760, %v4652_v13 }
 0x2d3   :  { %v2194_v60 = vsub.f32 %v4652_v13, %v2193_v19 }
 0x2d5   :  { %v2195_v61 = vand.u32 4294901760, %v2194_v60 }
 0x2d7   :  { %3466 = vmatprep.mubr.f32.mxu0 %v2195_v61 }
 0x2d8   :  { %3453 = vmatmul.mubr.f32.vlgmr.msra.gmra.mrb[0].mxu1 %v4537_v25  ;;  %v4677_v25 = vand.u32 4294901760, %v2120_v15 }
 0x2d9   :  { %3455 = vmatprep.mubr.f32.mxu1 %v4539_v29  ;;  %v1426_v29 = vadd.f32 %v3267_v48, %v1245_v46 }
 0x2da   :  { %v4684_v16 = vsub.f32 %v2120_v15, %v4677_v25 }
 0x2dc   :  { %3456 = vmatmul.mubr.f32.gmra.mrb[2].mxu1 %v4543_v32  ;;  %v4680_v32 = vsub.f32 %v2117_v22, %v4671_v54  ;;  %v2223_v35 = vand.u32 4294901760, %v4684_v16 }
 0x2de   :  { %v2213_v5 = vand.u32 4294901760, %v4680_v32  ;;  %v2224_v51 = vsub.f32 %v4684_v16, %v2223_v35 }
 0x2e0   :  { %v2214_v0 = vsub.f32 %v4680_v32, %v2213_v5  ;;  %v2225_v22 = vand.u32 4294901760, %v2224_v51 }
 0x2e2   :  { %v2215_v61 = vand.u32 4294901760, %v2214_v0 }
 0x3ab   :  { %v3454_v38 = vpop.f32.mrb[0].mxu1 }
 0x3ac   :  { %v3799_v49 = vadd.f32 %v3454_v38, %v1406_v39  ;;  %v2056_v6 = vpop.f32.mrb[1].mxu1 }
 0x3ad   :  { %v3801_v50 = vadd.f32 %v2056_v6, %v1396_v36 }
 0x3ae   :  { %v2079_v30 = vmax.f32 %v3799_v49, 0.0 }
 0x3af   :  { %v2078_v11 = vmax.f32 %v3801_v50, 0.0  ;;  %v3457_v37 = vpop.f32.mrb[2].mxu1 }
 0x3b0   :  { %v2126_v59 = vand.u32 4294901760, %v2079_v30  ;;  %v3803_v20 = vadd.f32 %v3457_v37, %v1426_v29  ;;  %v2068_v3 = vpop.f32.mrb[3].mxu1 }
 0x3b1   :  { %v2123_v8 = vand.u32 4294901760, %v2078_v11  ;;  %v3805_v9 = vadd.f32 %v2068_v3, %v1416_v45 }
 0x3b2   :  { %v2240_v1 = vsub.f32 %v2079_v30, %v2126_v59  ;;  %v2081_v2 = vmax.f32 %v3803_v20, 0.0 }
 0x3b3   :  { %v4687_v18 = vpack.c.bf16 %v2126_v59, %v2123_v8  ;;  %v2233_v53 = vsub.f32 %v2078_v11, %v2123_v8  ;;  %v2080_v58 = vmax.f32 %v3805_v9, 0.0  ;;  %v2783_v9 = vlaneseq }
 0x3b4   :  { %v2241_v24 = vand.u32 4294901760, %v2240_v1  ;;  %v2132_v26 = vand.u32 4294901760, %v2081_v2 }
 0x3b5   :  { %v2234_v34 = vand.u32 4294901760, %v2233_v53  ;;  %v2129_v23 = vand.u32 4294901760, %v2080_v58  ;;  %3735 = vmatprep.subr.bf16.mxu0 %v4687_v18  ;;  %v3750_v41 = vpack.c.bf16 %v2240_v1, %v2233_v53 }
 0x3b6   :  { %v2254_v33 = vsub.f32 %v2081_v2, %v2132_v26  ;;  %3737 = vmatpush3.bf16.msra.mxu0 %v4687_v18  ;;  %v2242_v42 = vsub.f32 %v2240_v1, %v2241_v24  ;;  %v2784_v2 = vshrl.u32 %v2783_v9, 7 }
 0x3b7   :  { %v3738_v27 = vpack.c.bf16 %v2132_v26, %v2129_v23  ;;  %v2247_v40 = vsub.f32 %v2080_v58, %v2129_v23  ;;  %v2235_v44 = vsub.f32 %v2233_v53, %v2234_v34  ;;  %v3766_v57 = vpack.c.bf16 %v2241_v24, %v2234_v34 }
 0x3b8   :  { %v2255_v12 = vand.u32 4294901760, %v2254_v33  ;;  %v2243_v48 = vand.u32 4294901760, %v2242_v42  ;;  %v2785_v53 = vsub.s32 0, %v2784_v2 }
 0x3b9   :  { %v2248_v47 = vand.u32 4294901760, %v2247_v40  ;;  %3739 = vmatprep.subr.bf16.mxu0 %v3738_v27  ;;  %v2236_v31 = vand.u32 4294901760, %v2235_v44  ;;  %v3754_v60 = vpack.c.bf16 %v2254_v33, %v2247_v40 }
 0x3ba   :  { %3741 = vmatpush3.bf16.msra.mxu0 %v3738_v27  ;;  %v2256_v62 = vsub.f32 %v2254_v33, %v2255_v12 }
 0x3bb   :  { %v3742_v63 = vpack.c.bf16 %v2243_v48, %v2236_v31  ;;  %v2249_v14 = vsub.f32 %v2247_v40, %v2248_v47  ;;  %v3770_v55 = vpack.c.bf16 %v2255_v12, %v2248_v47 }
 0x3bc   :  { %v2257_v21 = vand.u32 4294901760, %v2256_v62 }
 0x3bd   :  { %3467 = vmatmul.mubr.f32.vlgmr.msra.gmra.mrb[20].mxu0 %v2205_v43  ;;  %3743 = vmatprep.subr.bf16.mxu0 %v3742_v63  ;;  %v2250_v17 = vand.u32 4294901760, %v2249_v14 }
 0x3be   :  { %3745 = vmatpush3.bf16.msra.mxu0 %v3742_v63  ;;  %3469 = vmatprep.mubr.f32.mxu0 %v2215_v61 }
 0x3bf   :  { %v3746_v52 = vpack.c.bf16 %v2257_v21, %v2250_v17 }
 0x3c1   :  { %3470 = vmatmul.mubr.f32.gmra.mrb[22].mxu0 %v2225_v22  ;;  %3747 = vmatprep.subr.bf16.mxu0 %v3746_v52 }
 0x3c2   :  { %3749 = vmatpush3.bf16.msra.mxu0 %v3746_v52  ;;  %3480 = vmatprep.mubr.f32.mxu0 %v4649_v10 }
 0x3c3   :  { %3751 = vmatprep.subr.bf16.mxu0 %v3750_v41 }
 0x3c5   :  { %3481 = vmatmul.mubr.f32.vlgmr.msra.gmra.mrb[20].mxu0 %v4669_v56 }
 0x3c6   :  { %3753 = vmatpush3.bf16.msra.mxu0 %v3750_v41  ;;  %3483 = vmatprep.mubr.f32.mxu0 %v4671_v54 }
 0x3c7   :  { %3755 = vmatprep.subr.bf16.mxu0 %v3754_v60 }
 0x3c9   :  { %3484 = vmatmul.mubr.f32.gmra.mrb[22].mxu0 %v4677_v25 }
 0x3ca   :  { %3757 = vmatpush3.bf16.msra.mxu0 %v3754_v60  ;;  %3494 = vmatprep.mubr.f32.mxu0 %v4652_v13  ;;  %v2093_v13 = vpop.permute.xlu0 %2092 }
 0x3cb   :  { %3759 = vmatprep.subr.bf16.mxu0 %v4687_v18 }
 0x3cd   :  { %3495 = vmatmul.mubr.f32.vlgmr.msra.gmra.mrb[20].mxu0 %v4675_v7 }
 0x3ce   :  { %3761 = vmatpush3.bf16.msra.mxu0 %v4687_v18  ;;  %3497 = vmatprep.mubr.f32.mxu0 %v4680_v32  ;;  %v2103_v39 = vpop.permute.xlu0 %2102 }
 0x3cf   :  { %3763 = vmatprep.subr.bf16.mxu0 %v3738_v27 }
 0x3d1   :  { %3498 = vmatmul.mubr.f32.gmra.mrb[22].mxu0 %v4684_v16 }
 0x3d2   :  { %3765 = vmatpush3.bf16.msra.mxu0 %v3738_v27  ;;  %3508 = vmatprep.mubr.f32.mxu0 %v2193_v19  ;;  %v2098_v19 = vpop.permute.xlu1 %2097  ;;  %v2748_v7 = vpop.permute.xlu0 %2747 }
 0x3d3   :  { %3767 = vmatprep.subr.bf16.mxu0 %v3766_v57 }
 0x3d5   :  { %3509 = vmatmul.mubr.f32.vlgmr.msra.gmra.mrb[20].mxu0 %v2203_v4 }
 0x3d6   :  { %3769 = vmatpush3.bf16.msra.mxu0 %v3766_v57  ;;  %3511 = vmatprep.mubr.f32.mxu0 %v2213_v5  ;;  %v2108_v15 = vpop.permute.xlu1 %2107  ;;  %v2758_v59 = vpop.permute.xlu0 %2757 }
 0x3d7   :  { %3771 = vmatprep.subr.bf16.mxu0 %v3770_v55 }
 0x3d9   :  { %3512 = vmatmul.mubr.f32.gmra.mrb[22].mxu0 %v2223_v35 }
 0x3da   :  { %3773 = vmatpush3.bf16.msra.mxu0 %v3770_v55  ;;  %3522 = vmatprep.mubr.f32.mxu0 %v4649_v10  ;;  %v2753_v50 = vpop.permute.xlu1 %2752  ;;  %v2781_v24 = vpop.permute.xlu0 %2780 }
 0x3db   :  { %3775 = vmatprep.subr.bf16.mxu0 %v4687_v18  ;;  %v2786_v28 = vrot.slane %v2781_v24, %v2785_v53 }
 0x3dd   :  { %3523 = vmatmul.mubr.f32.vlgmr.msra.gmra.mrb[20].mxu0 %v4669_v56 }
 0x3de   :  { %3777 = vmatpush3.bf16.msra.mxu0 %v4687_v18  ;;  %3525 = vmatprep.mubr.f32.mxu0 %v4671_v54  ;;  %v2763_v3 = vpop.permute.xlu1 %2762 }
 0x3df   :  { %3779 = vmatprep.subr.bf16.mxu0 %v3738_v27 }
 0x3e1   :  { %3526 = vmatmul.mubr.f32.gmra.mrb[22].mxu0 %v4677_v25 }
 0x3e2   :  { %3781 = vmatpush3.bf16.msra.mxu0 %v3738_v27  ;;  %3536 = vmatprep.mubr.f32.mxu0 %v4649_v10 }
 0x3e5   :  { %3537 = vmatmul.mubr.f32.vlgmr.msra.gmra.mrb[20].mxu0 %v4669_v56 }
 0x3e6   :  { %3539 = vmatprep.mubr.f32.mxu0 %v4671_v54 }
 0x3e9   :  { %3540 = vmatmul.mubr.f32.gmra.mrb[22].mxu0 %v4677_v25 }
 0x4b8   :  { %v3538_v36 = vpop.f32.mrb[20].mxu0 }
 0x4b9   :  { %v3806_v38 = vadd.f32 %v3538_v36, %v2098_v19  ;;  %v2714_v49 = vpop.f32.mrb[21].mxu0 }
 0x4ba   :  { %v3807_v6 = vadd.f32 %v2714_v49, %v2093_v13 }
 0x4bb   :  { %v2737_v46 = vmax.f32 %v3806_v38, 0.0 }
 0x4bc   :  { %v2736_v29 = vmax.f32 %v3807_v6, 0.0  ;;  %v3541_v30 = vpop.f32.mrb[22].mxu0 }
 0x4bd   :  { %v2766_v10 = vmul.f32 %v2753_v50, %v2737_v46  ;;  %v3808_v32 = vadd.f32 %v3541_v30, %v2108_v15  ;;  %v2726_v56 = vpop.f32.mrb[23].mxu0 }
 0x4be   :  { %v2765_v45 = vmul.f32 %v2748_v7, %v2736_v29  ;;  %v3809_v54 = vadd.f32 %v2726_v56, %v2103_v39 }
 0x4bf   :  { %v2739_v25 = vmax.f32 %v3808_v32, 0.0 }
 0x4c0   :  { %v2769_v11 = vadd.f32 %v2766_v10, %v2765_v45  ;;  %v2738_v37 = vmax.f32 %v3809_v54, 0.0 }
 0x4c1   :  { %v2768_v4 = vmul.f32 %v2763_v3, %v2739_v25 }
 0x4c2   :  { %v2767_v20 = vmul.f32 %v2758_v59, %v2738_v37 }
 0x4c4   :  { %v2770_v8 = vadd.f32 %v2769_v11, %v2767_v20 }
 0x4c6   :  { %v2771_v16 = vadd.f32 %v2770_v8, %v2768_v4 }
 0x4c8   :  { %v2772_v1 = vrot.slane %v2771_v16, 4 }
 0x4ca   :  { %v2773_v5 = vadd.f32 %v2772_v1, %v2771_v16 }
 0x4cc   :  { %v2774_v18 = vrot.slane %v2773_v5, 2 }
 0x4ce   :  { %v2775_v58 = vadd.f32 %v2774_v18, %v2773_v5 }
 0x4d0   :  { %v2776_v26 = vrot.slane %v2775_v58, 1 }
 0x4d2   :  { %v2777_v34 = vadd.f32 %v2776_v26, %v2775_v58 }
 0x4d4   :  { %v2787_v23 = vadd.f32 %v2786_v28, %v2777_v34 }
 0x4d6   :  { %2788 = vst [vmem:[#allocation3] sm:$0x1] %v2787_v23 }
 0x4d7   :  { %3941 = shalt.err (!%p3938_p4)
}
 0x4d8   :  { %s3942_s14 = scalar_lea.hbm %s4746_s9, 16 }
 0x4d9   :  { %p3943_p5 = scmp.ne.s32.totalorder %s4746_s9, %s3942_s14  ;;  %p3946_p6 = scmp.lt.u32.totalorder %s3942_s14, %s4746_s9 }
 0x4db   :  { %p3948_p7 = pnand %p3946_p6, %p3943_p5 }
 0x4dd   :  { %3951 = shalt.err (!%p3948_p7)
}
 0x4de   :  { %2798 = dma.vmem_to_hbm [thread:$0]  %s2796_s30, 16, %s4746_s9, [#allocation4]  }
 0x4df   :  { %3952 = dma.done.wait [#allocation4], 16  }
 0x4e0   :  { %3953 = vsyncadd [#allocation4], 4294967280 }
 0x4e1   :  { %2802 = vsyncpa [#allocation4], 1 }

</bundles_post_ra>
